<compile_context>
chip_gen: v7x
topology: tpu7x:2x2x1
jax: 0.10.0
libtpu: 0.0.40
codegen_flags: <defaults>
</compile_context>

<pallas_src>
import functools
import math

import jax
import jax.numpy as jnp
from jax.experimental import pallas as pl
from jax.experimental.pallas import tpu as pltpu


# ----------------------------------------------------------------------------
# Fused (LayerNorm?) + Linear (+ bias, + QuickGELU?, + residual?) kernel
# ----------------------------------------------------------------------------
def _linear_kernel(*refs, activation, fuse_ln, has_residual):
    if fuse_ln:
        x_ref, g_ref, beta_ref, w_ref, b_ref = refs[:5]
        rest = refs[5:]
    else:
        x_ref, w_ref, b_ref = refs[:3]
        rest = refs[3:]
    if has_residual:
        res_ref, o_ref = rest
    else:
        (o_ref,) = rest

    x = x_ref[...]
    if fuse_ln:
        xf = x.astype(jnp.float32)
        mean = jnp.mean(xf, axis=-1, keepdims=True)
        var = jnp.mean(jnp.square(xf - mean), axis=-1, keepdims=True)
        xf = (xf - mean) * jax.lax.rsqrt(var + 1e-5)
        x = xf * g_ref[...].astype(jnp.float32) + beta_ref[...].astype(jnp.float32)

    acc = jnp.dot(x.astype(w_ref.dtype), w_ref[...],
                  preferred_element_type=jnp.float32)
    acc = acc + b_ref[...].astype(jnp.float32)
    if activation == "quick_gelu":
        acc = acc * jax.nn.sigmoid(1.702 * acc)   # QuickGELU: x * sigmoid(1.702 x)
    if has_residual:
        acc = acc + res_ref[...].astype(jnp.float32)
    o_ref[...] = acc.astype(o_ref.dtype)


def fused_linear(x, w, b, *, gamma=None, beta=None, activation="none",
                 residual=None, n_tile=None, out_dtype=None):
    """x:(M,K) @ w:(K,N) + b, optionally preceded by LayerNorm(gamma,beta) on x,
    followed by QuickGELU, followed by + residual.  Tiled over N."""
    M, K = x.shape
    N = w.shape[1]
    out_dtype = out_dtype or x.dtype
    if n_tile is None or (N % n_tile) != 0:
        n_tile = N                                    # full-N block (always legal)
    grid = (N // n_tile,)
    fuse_ln = gamma is not None
    has_residual = residual is not None

    in_specs = [pl.BlockSpec((M, K), lambda j: (0, 0))]
    args = [x]
    if fuse_ln:
        in_specs += [pl.BlockSpec((1, K), lambda j: (0, 0)),
                     pl.BlockSpec((1, K), lambda j: (0, 0))]
        args += [gamma.reshape(1, K), beta.reshape(1, K)]
    in_specs += [pl.BlockSpec((K, n_tile), lambda j: (0, j)),
                 pl.BlockSpec((1, n_tile), lambda j: (0, j))]
    args += [w, b.reshape(1, N)]
    if has_residual:
        in_specs.append(pl.BlockSpec((M, n_tile), lambda j: (0, j)))
        args.append(residual)

    return pl.pallas_call(
        functools.partial(_linear_kernel, activation=activation,
                          fuse_ln=fuse_ln, has_residual=has_residual),
        out_shape=jax.ShapeDtypeStruct((M, N), out_dtype),
        grid=grid,
        in_specs=in_specs,
        out_specs=pl.BlockSpec((M, n_tile), lambda j: (0, j)),
        compiler_params=pltpu.CompilerParams(dimension_semantics=("parallel",)),
    )(*args)


# ----------------------------------------------------------------------------
# Attention cores: per-batch block, all heads packed along the lane dimension,
# out_proj (and residual for self-attention) fused into the kernel.
# ----------------------------------------------------------------------------
def _sdpa_heads(q_all, k_all, v_all, num_heads, hd, scale):
    outs = []
    for h in range(num_heads):
        q = q_all[:, h * hd:(h + 1) * hd]
        k = k_all[:, h * hd:(h + 1) * hd]
        v = v_all[:, h * hd:(h + 1) * hd]
        # contract on the last dim of both operands -> no explicit k.T relayout
        s = jax.lax.dot_general(q, k, (((1,), (1,)), ((), ())),
                                preferred_element_type=jnp.float32) * scale
        s = s - jnp.max(s, axis=-1, keepdims=True)
        p = jnp.exp(s)
        p = p / jnp.sum(p, axis=-1, keepdims=True)
        outs.append(jnp.dot(p.astype(v.dtype), v,
                            preferred_element_type=jnp.float32))
    return outs[0] if num_heads == 1 else jnp.concatenate(outs, axis=-1)


def _self_attn_kernel(qkv_ref, wo_ref, bo_ref, res_ref, o_ref, *, num_heads, scale):
    D = o_ref.shape[-1]
    hd = D // num_heads
    qkv = qkv_ref[...]                                     # (L, 3D) bf16
    attn = _sdpa_heads(qkv[:, :D], qkv[:, D:2 * D], qkv[:, 2 * D:],
                       num_heads, hd, scale)               # (L, D) fp32
    out = jnp.dot(attn.astype(wo_ref.dtype), wo_ref[...],
                  preferred_element_type=jnp.float32)
    out = out + bo_ref[...].astype(jnp.float32) + res_ref[...].astype(jnp.float32)
    o_ref[...] = out.astype(o_ref.dtype)


def _cross_attn_kernel(q_ref, kv_ref, wo_ref, bo_ref, o_ref, *, num_heads, scale):
    D = o_ref.shape[-1]
    hd = D // num_heads
    q_all = q_ref[...]                                     # (Lq, D)
    kv = kv_ref[...]                                       # (Lk, 2D)
    attn = _sdpa_heads(q_all, kv[:, :D], kv[:, D:], num_heads, hd, scale)
    out = jnp.dot(attn.astype(wo_ref.dtype), wo_ref[...],
                  preferred_element_type=jnp.float32)
    out = out + bo_ref[...].astype(jnp.float32)
    o_ref[...] = out.astype(o_ref.dtype)


def self_attention_residual(x, p, num_heads):
    """x + MHA(ln_1(x)); LN fused into the QKV projection, out_proj + residual
    fused into the attention kernel."""
    B, L, D = x.shape
    x2 = x.reshape(B * L, D)
    qkv = fused_linear(x2, p["wqkv_t"], p["bqkv"],
                       gamma=p["ln1_g"], beta=p["ln1_b"]).reshape(B, L, 3 * D)
    scale = 1.0 / math.sqrt(D // num_heads)
    return pl.pallas_call(
        functools.partial(_self_attn_kernel, num_heads=num_heads, scale=scale),
        out_shape=jax.ShapeDtypeStruct((B, L, D), x.dtype),
        grid=(B,),
        in_specs=[
            pl.BlockSpec((None, L, 3 * D), lambda b: (b, 0, 0)),
            pl.BlockSpec((D, D), lambda b: (0, 0)),
            pl.BlockSpec((1, D), lambda b: (0, 0)),
            pl.BlockSpec((None, L, D), lambda b: (b, 0, 0)),
        ],
        out_specs=pl.BlockSpec((None, L, D), lambda b: (b, 0, 0)),
        compiler_params=pltpu.CompilerParams(dimension_semantics=("parallel",)),
    )(qkv, p["wo_t"], p["bo"].reshape(1, D), x)


def cross_attention(q, kv, p, ln_t, ln_i, num_heads):
    """MHA(ln_pre_t(q), ln_pre_i(kv), ln_pre_i(kv)) — k and v share one fused
    (D,2D) projection since they are the same tensor."""
    B, Lq, D = q.shape
    Lk = kv.shape[1]
    q2 = fused_linear(q.reshape(B * Lq, D), p["wq_t"], p["bq"],
                      gamma=ln_t[0], beta=ln_t[1]).reshape(B, Lq, D)
    kv2 = fused_linear(kv.reshape(B * Lk, D), p["wkv_t"], p["bkv"],
                       gamma=ln_i[0], beta=ln_i[1]).reshape(B, Lk, 2 * D)
    scale = 1.0 / math.sqrt(D // num_heads)
    return pl.pallas_call(
        functools.partial(_cross_attn_kernel, num_heads=num_heads, scale=scale),
        out_shape=jax.ShapeDtypeStruct((B, Lq, D), q.dtype),
        grid=(B,),
        in_specs=[
            pl.BlockSpec((None, Lq, D), lambda b: (b, 0, 0)),
            pl.BlockSpec((None, Lk, 2 * D), lambda b: (b, 0, 0)),
            pl.BlockSpec((D, D), lambda b: (0, 0)),
            pl.BlockSpec((1, D), lambda b: (0, 0)),
        ],
        out_specs=pl.BlockSpec((None, Lq, D), lambda b: (b, 0, 0)),
        compiler_params=pltpu.CompilerParams(dimension_semantics=("parallel",)),
    )(q2, kv2, p["wo_t"], p["bo"].reshape(1, D))


# ----------------------------------------------------------------------------
# CFFA sub-modules (glue in JAX, compute in Pallas)
# ----------------------------------------------------------------------------
def residual_attention_block(x, p, num_heads):
    """CLIP block: x += attn(ln_1(x)); x += mlp(ln_2(x)) with QuickGELU MLP.
    ln_2 is fused into the fc matmul; the residual add into the proj matmul."""
    x = self_attention_residual(x, p, num_heads)
    B, L, D = x.shape
    x2 = x.reshape(B * L, D)
    h = fused_linear(x2, p["fc_w_t"], p["fc_b"],
                     gamma=p["ln2_g"], beta=p["ln2_b"],
                     activation="quick_gelu")                    # D -> 4D
    out = fused_linear(h, p["proj_w_t"], p["proj_b"], residual=x2)  # 4D -> D (+x)
    return out.reshape(B, L, D)


def cross_former(params, q, kv, num_heads):
    # The .permute(1,0,2) pairs around the transformer only change tensor layout
    # (seq-first vs batch-first); attention is computed per batch either way.
    x = cross_attention(q, kv, params["cross_attn"],
                        (params["ln_pre_t_g"], params["ln_pre_t_b"]),
                        (params["ln_pre_i_g"], params["ln_pre_i_b"]),
                        num_heads)
    for blk in params["blocks"]:
        x = residual_attention_block(x, blk, num_heads)
    # ln_post is fused into mlm_head's dense projection (see mlm_head below).
    return x


def mlm_head(params, x):
    """ln_post -> dense -> QuickGELU -> ln -> fc(vocab), as two fused kernels."""
    B, L, D = x.shape
    mp = params["mlm_head"]
    x2 = x.reshape(B * L, D)
    h = fused_linear(x2, mp["dense_w_t"], mp["dense_b"],
                     gamma=params["ln_post_g"], beta=params["ln_post_b"],
                     activation="quick_gelu")
    # 49408 = 128 * 386 -> lane-aligned tiles of 24704 (2 parallel grid steps);
    # bf16 weight tile = 3.16 MB/buffer, fp32 out tile = 1.58 MB/buffer.
    scores = fused_linear(h, mp["fc_w_t"], mp["fc_b"],
                          gamma=mp["ln_g"], beta=mp["ln_b"],
                          n_tile=24704, out_dtype=jnp.float32)
    return scores                                              # (B*L, vocab) fp32


def cffa_forward(params, image_feats, text_feats, mlm_feats, caption_ids,
                 temperature, num_classes):
    D = image_feats.shape[-1]
    heads = D // 64
    ret = {}
    ret["temperature"] = jnp.asarray(temperature, jnp.float32)   # 1 / logit_scale

    # TODO(synk): base_model / VisualEmbeddingLayer / TexualEmbeddingLayer /
    # objectives.compute_* are external; features stand in and losses are omitted.
    i_feats = image_feats[:, 0, :].astype(jnp.float32)
    eot_idx = jnp.argmax(caption_ids, axis=-1)
    t_feats = text_feats[jnp.arange(text_feats.shape[0]), eot_idx].astype(jnp.float32)
    ret["i_feats"] = i_feats
    ret["t_feats"] = t_feats

    # --- 'mlm' branch: cross_former + mlm_head -> scores over vocab ---
    q = mlm_feats.astype(jnp.bfloat16)          # bf16 end-to-end in the cross-former
    kv = image_feats.astype(jnp.bfloat16)       # (fp32 accumulation inside kernels)
    x = cross_former(params, q, kv, heads)
    scores = mlm_head(params, x)
    ret["mlm_scores"] = scores
    ret["mlm_pred"] = jnp.argmax(scores, axis=1)

    # --- 'mal' branch: classifier on reduced-precision features ---
    img_logits = fused_linear(i_feats.astype(jnp.bfloat16), params["classifier_w_t"],
                              params["classifier_b"], out_dtype=jnp.float32)
    txt_logits = fused_linear(t_feats.astype(jnp.bfloat16), params["classifier_w_t"],
                              params["classifier_b"], out_dtype=jnp.float32)
    ret["image_logits"] = img_logits[:, :num_classes]   # drop lane padding
    ret["text_logits"] = txt_logits[:, :num_classes]
    return ret


# ----------------------------------------------------------------------------
# Deterministic parameter construction (matches __init__ shapes / init stds);
# weights are stored pre-transposed (K, N) and in bf16, LN/bias params in fp32.
# ----------------------------------------------------------------------------
def init_params(key, D, vocab_size, num_classes, layers=4,
                compute_dtype=jnp.bfloat16):
    scale = D ** (-0.5)
    proj_std = scale * (2 * layers) ** (-0.5)
    attn_std = scale
    fc_std = (2 * D) ** (-0.5)

    keys = iter(jax.random.split(key, 64))

    def n(shape, std, dtype=compute_dtype):
        return (jax.random.normal(next(keys), shape, jnp.float32) * std).astype(dtype)

    ones = lambda s: jnp.ones(s, jnp.float32)
    zeros = lambda s: jnp.zeros(s, jnp.float32)

    blocks = []
    for _ in range(layers):
        blocks.append({
            "ln1_g": ones((D,)), "ln1_b": zeros((D,)),
            "ln2_g": ones((D,)), "ln2_b": zeros((D,)),
            "wqkv_t": n((D, 3 * D), attn_std), "bqkv": zeros((3 * D,)),
            "wo_t": n((D, D), proj_std), "bo": zeros((D,)),
            "fc_w_t": n((D, 4 * D), fc_std), "fc_b": zeros((4 * D,)),
            "proj_w_t": n((4 * D, D), proj_std), "proj_b": zeros((D,)),
        })

    # classifier: pad N=11003 -> next multiple of 128 for lane-dense stores
    ncls_pad = ((num_classes + 127) // 128) * 128
    cls_w = jax.random.normal(next(keys), (D, num_classes), jnp.float32) * 0.001
    cls_w = jnp.pad(cls_w, ((0, 0), (0, ncls_pad - num_classes))).astype(compute_dtype)

    return {
        "cross_attn": {
            "wq_t": n((D, D), attn_std), "bq": zeros((D,)),
            "wkv_t": n((D, 2 * D), attn_std), "bkv": zeros((2 * D,)),
            "wo_t": n((D, D), proj_std), "bo": zeros((D,)),
        },
        "blocks": blocks,
        "ln_pre_t_g": ones((D,)), "ln_pre_t_b": zeros((D,)),
        "ln_pre_i_g": ones((D,)), "ln_pre_i_b": zeros((D,)),
        "ln_post_g": ones((D,)), "ln_post_b": zeros((D,)),
        "mlm_head": {
            "dense_w_t": n((D, D), fc_std), "dense_b": zeros((D,)),
            "ln_g": ones((D,)), "ln_b": zeros((D,)),
            "fc_w_t": n((D, vocab_size), proj_std), "fc_b": zeros((vocab_size,)),
        },
        "classifier_w_t": cls_w,                 # (D, 11008) bf16, zero-padded cols
        "classifier_b": zeros((ncls_pad,)),
    }


# ----------------------------------------------------------------------------
if __name__ == "__main__":
    B, Li, Lt, D = 2, 17, 8, 64          # batch, image tokens (CLS+16), text tokens, embed_dim
    VOCAB, NUM_CLASSES = 49408, 11003
    TEMPERATURE = 0.02

    key = jax.random.PRNGKey(0)
    kp, k1, k2, k3, k4 = jax.random.split(key, 5)
    params = init_params(kp, D, VOCAB, NUM_CLASSES, layers=4)

    image_feats = jax.random.normal(k1, (B, Li, D), jnp.float32)
    text_feats = jax.random.normal(k2, (B, Lt, D), jnp.float32)
    mlm_feats = jax.random.normal(k3, (B, Lt, D), jnp.float32)
    caption_ids = jax.random.randint(k4, (B, Lt), 0, VOCAB, jnp.int32)

    ret = cffa_forward(params, image_feats, text_feats, mlm_feats, caption_ids,
                       TEMPERATURE, NUM_CLASSES)
    jax.block_until_ready(ret)

    assert ret["mlm_scores"].shape == (B * Lt, VOCAB)
    assert ret["mlm_scores"].dtype == jnp.float32
    assert ret["image_logits"].shape == (B, NUM_CLASSES)
    assert ret["text_logits"].shape == (B, NUM_CLASSES)
    assert ret["i_feats"].shape == (B, D) and ret["t_feats"].shape == (B, D)
    print("KERNEL_OK")
</pallas_src>

<mosaic_0001>
module attributes {stable_mosaic.version = 11 : i64} {
  func.func @_linear_kernel(%arg0: i32, %arg1: memref<16x64xbf16, #tpu.memory_space<vmem>>, %arg2: memref<1x64xf32, #tpu.memory_space<vmem>>, %arg3: memref<1x64xf32, #tpu.memory_space<vmem>>, %arg4: memref<64x64xbf16, #tpu.memory_space<vmem>>, %arg5: memref<1x64xf32, #tpu.memory_space<vmem>>, %arg6: memref<16x64xbf16, #tpu.memory_space<vmem>>) attributes {dimension_semantics = [#tpu.dimension_semantics<parallel>], iteration_bounds = array<i64: 1>, scalar_prefetch = 0 : i64, scratch_operands = 0 : i64, tpu.core_type = #tpu.core_type<tc>, window_params = [{pipeline_mode = #tpu.pipeline_mode<synchronous>, transform_indices = @transform_0, window_bounds = array<i64: 16, 64>}, {pipeline_mode = #tpu.pipeline_mode<synchronous>, transform_indices = @transform_1, window_bounds = array<i64: 1, 64>}, {pipeline_mode = #tpu.pipeline_mode<synchronous>, transform_indices = @transform_2, window_bounds = array<i64: 1, 64>}, {transform_indices = @transform_3, window_bounds = array<i64: 64, 64>}, {transform_indices = @transform_4, window_bounds = array<i64: 1, 64>}, {transform_indices = @transform_5, window_bounds = array<i64: 16, 64>}]} {
    %c0 = arith.constant 0 : index
    %c0_0 = arith.constant 0 : index
    %0 = vector.load %arg1[%c0, %c0_0] : memref<16x64xbf16, #tpu.memory_space<vmem>>, vector<16x64xbf16>
    %1 = arith.extf %0 : vector<16x64xbf16> to vector<16x64xf32>
    %cst = arith.constant dense<0.000000e+00> : vector<16xf32>
    %2 = vector.multi_reduction <add>, %1, %cst [1] : vector<16x64xf32> to vector<16xf32>
    %3 = vector.shape_cast %2 : vector<16xf32> to vector<16x1xf32>
    %cst_1 = arith.constant 6.400000e+01 : f32
    %4 = vector.broadcast %cst_1 : f32 to vector<16x1xf32>
    %5 = arith.divf %3, %4 : vector<16x1xf32>
    %6 = vector.broadcast %5 : vector<16x1xf32> to vector<16x64xf32>
    %7 = arith.subf %1, %6 : vector<16x64xf32>
    %8 = arith.mulf %7, %7 : vector<16x64xf32>
    %cst_2 = arith.constant dense<0.000000e+00> : vector<16xf32>
    %9 = vector.multi_reduction <add>, %8, %cst_2 [1] : vector<16x64xf32> to vector<16xf32>
    %10 = vector.shape_cast %9 : vector<16xf32> to vector<16x1xf32>
    %cst_3 = arith.constant 6.400000e+01 : f32
    %11 = vector.broadcast %cst_3 : f32 to vector<16x1xf32>
    %12 = arith.divf %10, %11 : vector<16x1xf32>
    %13 = vector.broadcast %5 : vector<16x1xf32> to vector<16x64xf32>
    %14 = arith.subf %1, %13 : vector<16x64xf32>
    %cst_4 = arith.constant 9.99999974E-6 : f32
    %15 = vector.broadcast %cst_4 : f32 to vector<16x1xf32>
    %16 = arith.addf %12, %15 : vector<16x1xf32>
    %17 = math.rsqrt %16 : vector<16x1xf32>
    %18 = vector.broadcast %17 : vector<16x1xf32> to vector<16x64xf32>
    %19 = arith.mulf %14, %18 : vector<16x64xf32>
    %c0_5 = arith.constant 0 : index
    %c0_6 = arith.constant 0 : index
    %20 = vector.load %arg2[%c0_5, %c0_6] : memref<1x64xf32, #tpu.memory_space<vmem>>, vector<1x64xf32>
    %21 = vector.broadcast %20 : vector<1x64xf32> to vector<16x64xf32>
    %22 = arith.mulf %19, %21 : vector<16x64xf32>
    %c0_7 = arith.constant 0 : index
    %c0_8 = arith.constant 0 : index
    %23 = vector.load %arg3[%c0_7, %c0_8] : memref<1x64xf32, #tpu.memory_space<vmem>>, vector<1x64xf32>
    %24 = vector.broadcast %23 : vector<1x64xf32> to vector<16x64xf32>
    %25 = arith.addf %22, %24 : vector<16x64xf32>
    %26 = arith.truncf %25 : vector<16x64xf32> to vector<16x64xbf16>
    %c0_9 = arith.constant 0 : index
    %c0_10 = arith.constant 0 : index
    %27 = vector.load %arg4[%c0_9, %c0_10] : memref<64x64xbf16, #tpu.memory_space<vmem>>, vector<64x64xbf16>
    %cst_11 = arith.constant dense<0.000000e+00> : vector<16x64xf32>
    %28 = tpu.matmul %26, %27, %cst_11 {dimension_numbers = #tpu.dot_dimension_numbers<[1], [0], [0], [1], [0, 0, 1, 1], [], []>} : vector<16x64xbf16>, vector<64x64xbf16>, vector<16x64xf32> -> vector<16x64xf32>
    %c0_12 = arith.constant 0 : index
    %c0_13 = arith.constant 0 : index
    %29 = vector.load %arg5[%c0_12, %c0_13] : memref<1x64xf32, #tpu.memory_space<vmem>>, vector<1x64xf32>
    %30 = vector.broadcast %29 : vector<1x64xf32> to vector<16x64xf32>
    %31 = arith.addf %28, %30 : vector<16x64xf32>
    %32 = arith.truncf %31 : vector<16x64xf32> to vector<16x64xbf16>
    %c0_14 = arith.constant 0 : index
    %c0_15 = arith.constant 0 : index
    %33 = vector.load %arg6[%c0_14, %c0_15] : memref<16x64xbf16, #tpu.memory_space<vmem>>, vector<16x64xbf16>
    tpu.vector_store %arg6[%c0_14, %c0_15], %32 {strides = array<i32>} : memref<16x64xbf16, #tpu.memory_space<vmem>>, vector<16x64xbf16>,
    return
  }
  func.func @transform_0(%arg0: i32) -> (i32, i32) {
    %c0_i32 = arith.constant 0 : i32
    %c0_i32_0 = arith.constant 0 : i32
    %c0_i32_1 = arith.constant 0 : i32
    return %c0_i32, %c0_i32_0 : i32, i32
  }
  func.func @transform_1(%arg0: i32) -> (i32, i32) {
    %c0_i32 = arith.constant 0 : i32
    %c0_i32_0 = arith.constant 0 : i32
    %c0_i32_1 = arith.constant 0 : i32
    return %c0_i32, %c0_i32_0 : i32, i32
  }
  func.func @transform_2(%arg0: i32) -> (i32, i32) {
    %c0_i32 = arith.constant 0 : i32
    %c0_i32_0 = arith.constant 0 : i32
    %c0_i32_1 = arith.constant 0 : i32
    return %c0_i32, %c0_i32_0 : i32, i32
  }
  func.func @transform_3(%arg0: i32) -> (i32, i32) {
    %c0_i32 = arith.constant 0 : i32
    %c0_i32_0 = arith.constant 0 : i32
    return %c0_i32, %arg0 : i32, i32
  }
  func.func @transform_4(%arg0: i32) -> (i32, i32) {
    %c0_i32 = arith.constant 0 : i32
    %c0_i32_0 = arith.constant 0 : i32
    return %c0_i32, %arg0 : i32, i32
  }
  func.func @transform_5(%arg0: i32) -> (i32, i32) {
    %c0_i32 = arith.constant 0 : i32
    %c0_i32_0 = arith.constant 0 : i32
    return %c0_i32, %arg0 : i32, i32
  }
}

</mosaic_0001>

<bundles_post_ra>
// kernel: tpu_custom_call.1
= control target key start
LH: loop header
LB: loop body
LE: loop exit
PB: predicated region body
PF: predicated region fallthrough
CT: control target
= control target key end

     0   :  { %10 = vsyncpa [#allocation3], 0  ;;  %s429_s0 = inlined_call_operand.hbm [shape: bf16[16,64], index: 0, kind: input, shape index: {}]   ;;  %s430_s1 = inlined_call_operand.vmem [shape: f32[1,64], index: 1, kind: input, shape index: {}]   ;;  %s431_s2 = inlined_call_operand.vmem [shape: f32[1,64], index: 2, kind: input, shape index: {}]   ;;  %s432_s3 = inlined_call_operand.hbm [shape: bf16[64,64], index: 3, kind: input, shape index: {}]   ;;  %s433_s4 = inlined_call_operand.vmem [shape: f32[1,64], index: 4, kind: input, shape index: {}]   ;;  %s434_s5 = inlined_call_operand.hbm [shape: bf16[16,64], index: 5, kind: output, shape index: {}]  }
   0x1   :  { %11 = vsyncpa [#allocation6], 0 }
   0x2   :  { %12 = vsyncpa [#allocation4], 0  ;;  %s333_s18 = smov [#allocation2]   ;;  %s261_s22 = scalar_lea.hbm %s429_s0, 128 }
   0x3   :  { %s18_s19 = sshll.u32 %s333_s18, 4  ;;  %p262_p0 = scmp.ne.s32.totalorder %s429_s0, %s261_s22  ;;  %s19_s19 = int_to_ptr.vmem [resolvable:$true] %s18_s19 }
   0x4   :  { %p265_p1 = scmp.lt.u32.totalorder %s261_s22, %s429_s0 }
   0x6   :  { %p267_p2 = pnand %p265_p1, %p262_p0 }
   0x8   :  { %270 = shalt.err (!%p267_p2)
}
   0x9   :  { %s271_s27 = scalar_lea.vmem %s19_s19, 128  ;;  %p276_p4 = scmp.lt.s32.totalorder %s19_s19, %s19_s19 }
   0xa   :  { %p272_p3 = scmp.ne.s32.totalorder %s19_s19, %s271_s27  ;;  %p277_p5 = scmp.lt.s32.totalorder %s271_s27, %s271_s27 }
   0xc   :  { %p278_p6 = por %p277_p5, %p276_p4 }
   0xe   :  { %p279_p7 = pnand %p278_p6, %p272_p3 }
  0x10   :  { %282 = shalt.err (!%p279_p7)
}
  0x11   :  { %s334_s28 = smov 64   ;;  %s335_s29 = smov 4  }
  0x12   :  { %24 = dma.hbm_to_vmem [thread:$0]  %s429_s0, 128, %s19_s19, [#allocation3], %s334_s28, %s334_s28, %s335_s29  }
  0x13   :  { %s336_s7 = smov [#allocation5]   ;;  %s283_s11 = scalar_lea.hbm %s432_s3, 512 }
  0x14   :  { %s34_s8 = sshll.u32 %s336_s7, 4  ;;  %p284_p8 = scmp.ne.s32.totalorder %s432_s3, %s283_s11  ;;  %s35_s8 = int_to_ptr.vmem [resolvable:$true] %s34_s8 }
  0x15   :  { %p287_p9 = scmp.lt.u32.totalorder %s283_s11, %s432_s3 }
  0x17   :  { %p289_p10 = pnand %p287_p9, %p284_p8 }
  0x19   :  { %292 = shalt.err (!%p289_p10)
}
  0x1a   :  { %s293_s16 = scalar_lea.vmem %s35_s8, 512  ;;  %p298_p12 = scmp.lt.s32.totalorder %s35_s8, %s35_s8 }
  0x1b   :  { %p294_p11 = scmp.ne.s32.totalorder %s35_s8, %s293_s16  ;;  %p299_p13 = scmp.lt.s32.totalorder %s293_s16, %s293_s16 }
  0x1d   :  { %p300_p0 = por %p299_p13, %p298_p12 }
  0x1f   :  { %p301_p1 = pnand %p300_p0, %p294_p11 }
  0x21   :  { %304 = shalt.err (!%p301_p1)
}
  0x22   :  { %40 = dma.hbm_to_vmem [thread:$0]  %s432_s3, 512, %s35_s8, [#allocation6], %s334_s28, %s334_s28, %s335_s29  }
  0x23   :  { %327 = dma.done.wait [#allocation3], 128  }
  0x24   :  { %328 = vsyncadd [#allocation3], 4294967168 }
  0x25   :  { %329 = dma.done.wait [#allocation6], 512  }
  0x26   :  { %330 = vsyncadd [#allocation6], 4294966784  ;;  %v226_v0 = vld [vmem:[#allocation2] sm:$0xff]   ;;  %vm54_vm0 = vcmask 523264   ;;  %v253_v15 = vld [vmem:[#allocation5] sm:$0xff]   ;;  %v337_v16 = vmov 0.0  }
  0x27   :  { %v227_v1 = vunpack.c.l.bf16 %v226_v0  ;;  %v228_v2 = vunpack.c.h.bf16 %v226_v0  ;;  %234 = vmatprep.subr.bf16.mxu0 %v337_v16  ;;  %v254_v17 = vld [vmem:[#allocation5 + $0x8] sm:$0xff]   ;;  %v255_v18 = vld [vmem:[#allocation5 + $0x10] sm:$0xff]   ;;  %v256_v19 = vld [vmem:[#allocation5 + $0x18] sm:$0xff]   ;;  %vm338_vm1 = vmmov 0   ;;  %vm192_vm2 = vcmask 519168  }
  0x28   :  { %235 = vmatpush3.bf16.msra.mxu0 %v253_v15  ;;  %242 = vmatprep.mubr.msk.bf16.mxu0 %vm338_vm1, %v337_v16  ;;  %v213_v28 = vld [vmem:[%s430_s1] ss:$0 sm:$0xff]  ;;  %s339_s1 = smov [#allocation7]  }
  0x29   :  { %v55_v3 = vsel %vm54_vm0, %v227_v1, 0.0  ;;  %v58_v4 = vsel %vm54_vm0, %v228_v2, 0.0  ;;  %236 = vmatprep.subr.bf16.mxu0 %v337_v16  ;;  %v214_v32 = vld [vmem:[%s431_s2] ss:$0 sm:$0xff]  ;;  %s200_s23 = sshll.u32 %s339_s1, 4  ;;  %s201_s23 = int_to_ptr.vmem [resolvable:$true] %s200_s23 }
  0x2a   :  { %56 = vadd.xlane.f32.xlu0 %v55_v3  ;;  %v215_v37 = vld [vmem:[%s433_s4] ss:$0 sm:$0xff]  ;;  %s305_s2 = scalar_lea.vmem %s201_s23, 128  ;;  %p310_p3 = scmp.lt.s32.totalorder %s201_s23, %s201_s23 }
  0x2b   :  { %p306_p2 = scmp.ne.s32.totalorder %s201_s23, %s305_s2  ;;  %p311_p4 = scmp.lt.s32.totalorder %s305_s2, %s305_s2 }
  0x2c   :  { %237 = vmatpush3.bf16.msra.mxu0 %v254_v17 }
  0x2d   :  { %238 = vmatprep.subr.bf16.mxu0 %v337_v16  ;;  %p312_p5 = por %p311_p4, %p310_p3 }
  0x2e   :  { %59 = vadd.xlane.f32.xlu0 %v58_v4 }
  0x2f   :  { %p313_p6 = pnand %p312_p5, %p306_p2 }
  0x30   :  { %239 = vmatpush3.bf16.msra.mxu0 %v255_v18 }
  0x31   :  { %240 = vmatprep.subr.bf16.mxu0 %v337_v16 }
  0x34   :  { %241 = vmatpush3.bf16.msra.mxu0 %v256_v19 }
  0xb7   :  { %v57_v5 = vpop.xlane.xlu0 %56 }
  0xb8   :  { %v62_v6 = vmul.f32 0.015625, %v57_v5 }
  0xba   :  { %v64_v7 = vsub.f32 %v227_v1, %v62_v6 }
  0xbb   :  { %v60_v8 = vpop.xlane.xlu0 %59 }
  0xbc   :  { %v63_v9 = vmul.f32 0.015625, %v60_v8  ;;  %v66_v10 = vmul.f32 %v64_v7, %v64_v7 }
  0xbe   :  { %v65_v11 = vsub.f32 %v228_v2, %v63_v9  ;;  %v68_v12 = vsel %vm54_vm0, %v66_v10, 0.0 }
  0xbf   :  { %69 = vadd.xlane.f32.xlu1 %v68_v12 }
  0xc0   :  { %v67_v13 = vmul.f32 %v65_v11, %v65_v11 }
  0xc2   :  { %v71_v14 = vsel %vm54_vm0, %v67_v13, 0.0 }
  0xc3   :  { %72 = vadd.xlane.f32.xlu1 %v71_v14 }
 0x14c   :  { %v70_v20 = vpop.xlane.xlu1 %69 }
 0x14d   :  { %v74_v21 = vmul.f32 0.015625, %v70_v20 }
 0x14f   :  { %v76_v22 = vadd.f32 1e-05, %v74_v21 }
 0x150   :  { %v73_v23 = vpop.xlane.xlu1 %72 }
 0x151   :  { %257 = vrsqrt.f32 %v76_v22  ;;  %v75_v24 = vmul.f32 0.015625, %v73_v23 }
 0x153   :  { %v77_v25 = vadd.f32 1e-05, %v75_v24 }
 0x155   :  { %259 = vrsqrt.f32 %v77_v25 }
 0x15b   :  { %v258_v26 = vpop.eup %257 }
 0x15c   :  { %v80_v27 = vmul.f32 %v258_v26, %v64_v7 }
 0x15e   :  { %v89_v31 = vmul.f32 %v213_v28, %v80_v27 }
 0x15f   :  { %v260_v29 = vpop.eup %259 }
 0x160   :  { %v81_v30 = vmul.f32 %v260_v29, %v65_v11  ;;  %v98_v34 = vadd.f32 %v214_v32, %v89_v31 }
 0x162   :  { %v90_v33 = vmul.f32 %v213_v28, %v81_v30 }
 0x164   :  { %v99_v35 = vadd.f32 %v214_v32, %v90_v33 }
 0x166   :  { %v100_v36 = vpack.c.bf16 %v99_v35, %v98_v34 }
 0x168   :  { %243 = vmatmul.mubr.msk.bf16.vlgmr.msra.gmra.mrb[0].mxu0 %vm54_vm0, %v100_v36 }
 0x23b   :  { %v177_v38 = vpop.f32.mrb[0].mxu0 }
 0x23c   :  { %v178_v39 = vadd.f32 %v215_v37, %v177_v38  ;;  %v244_v40 = vpop.f32.mrb[1].mxu0 }
 0x23d   :  { %v180_v41 = vpop.f32.mrb[2].mxu0 }
 0x23e   :  { %v223_v42 = vpack.c.bf16 %v178_v39, %v178_v39  ;;  %v181_v43 = vadd.f32 %v215_v37, %v180_v41  ;;  %v245_v44 = vpop.f32.mrb[3].mxu0 }
 0x240   :  { %v224_v45 = vpack.c.bf16 %v181_v43, %v181_v43  ;;  %193 = vst.msk [vmem:[#allocation7] sm:$0xf] %vm192_vm2, %v223_v42 }
 0x242   :  { %194 = vst.msk [vmem:[#allocation7 + $0x4] sm:$0xf] %vm192_vm2, %v224_v45 }
 0x243   :  { %316 = shalt.err (!%p313_p6)
}
 0x244   :  { %s317_s25 = scalar_lea.hbm %s434_s5, 128 }
 0x245   :  { %p318_p7 = scmp.ne.s32.totalorder %s434_s5, %s317_s25  ;;  %p321_p8 = scmp.lt.u32.totalorder %s317_s25, %s434_s5 }
 0x247   :  { %p323_p9 = pnand %p321_p8, %p318_p7 }
 0x249   :  { %326 = shalt.err (!%p323_p9)
}
 0x24a   :  { %206 = dma.vmem_to_hbm [thread:$0]  %s201_s23, 128, %s434_s5, [#allocation4], %s334_s28, %s334_s28, %s335_s29  }
 0x24b   :  { %331 = dma.done.wait [#allocation4], 128  }
 0x24c   :  { %332 = vsyncadd [#allocation4], 4294967168 }
 0x24d   :  { %210 = vsyncpa [#allocation3], 1 }
 0x24e   :  { %211 = vsyncpa [#allocation6], 1 }
 0x24f   :  { %212 = vsyncpa [#allocation4], 1 }

</bundles_post_ra>
